<compile_context>
chip_gen: v6e
topology: v6e:2x2x1
jax: 0.10.0
libtpu: 0.0.40
codegen_flags: <defaults>
</compile_context>

<pallas_src>
import functools
import math

import jax
import jax.numpy as jnp
from jax.experimental import pallas as pl
from jax.experimental.pallas import tpu as pltpu


def _rmsnorm_kernel(*refs, dim, d_x, eps, affine, mask_cols):
    # refs = (x_ref[, scale_ref, bias_ref], o_ref)
    if affine:
        x_ref, scale_ref, bias_ref, o_ref = refs
    else:
        x_ref, o_ref = refs

    x = x_ref[...].astype(jnp.float32)          # (block_rows, dim)

    if mask_cols:
        # Partial RMSNorm: one (1, dim) mask row, broadcast-multiplied in.
        col = jax.lax.broadcasted_iota(jnp.int32, (1, dim), 1)
        mask = (col < d_x).astype(jnp.float32)   # (1, dim)
        part = x * mask
    else:
        part = x

    ssq = jnp.sum(part * part, axis=-1, keepdims=True)   # (block_rows, 1)
    rms = jnp.sqrt(ssq) * (float(d_x) ** -0.5)
    inv = 1.0 / (rms + eps)                               # exact, one per row

    if affine:
        # scale/bias are already f32 (pre-cast in the wrapper).
        out = (x * inv) * scale_ref[...] + bias_ref[...]
    else:
        out = x * inv

    o_ref[...] = out.astype(o_ref.dtype)


def rmsnorm(x, scale=None, bias=None, *, p=-1.0, eps=1e-8, affine=True,
            block_rows=None):
    """RMSNorm over the last axis of x (PyTorch RMSNorm forward semantics)."""
    orig_shape = x.shape
    dim = orig_shape[-1]
    rows = int(math.prod(orig_shape[:-1])) if len(orig_shape) > 1 else 1
    x2 = x.reshape(rows, dim)

    # Partial-norm width (PyTorch semantics). d_x == 0 diverges, matching torch.
    if p < 0.0 or p > 1.0:
        d_x = dim
    else:
        d_x = int(dim * p)

    itemsize = jnp.dtype(x.dtype).itemsize
    # Sublane packing: 8 rows (f32), 16 (bf16), 32 (int8/fp8).
    sublane = (4 // max(itemsize, 1)) * 8

    if block_rows is None:
        # VMEM byte budget per row of a block:
        #   double-buffered in + out blocks : 4 * dim * itemsize
        #   live f32 working copies (x, out): ~2 * dim * 4
        # Keep the total under the 32 MiB scoped VMEM limit (safe on all gens;
        # v7x only has 64 MiB physical VMEM, so don't raise the limit there).
        budget = 28 * 1024 * 1024
        per_row_bytes = dim * (4 * itemsize + 8)
        block_rows = max(1, budget // per_row_bytes)

    if rows <= sublane:
        # Tiny input: a single full-extent block is always layout-legal.
        block_rows = rows
    else:
        # Keep >= ~4 grid steps when possible so v7x's second TensorCore gets
        # work and DMA overlaps compute; round to the sublane packing.
        cap = ((pl.cdiv(rows, 4) + sublane - 1) // sublane) * sublane
        block_rows = min(block_rows, max(sublane, cap))
        block_rows = max(sublane, (block_rows // sublane) * sublane)

    grid = (pl.cdiv(rows, block_rows),)

    in_specs = [pl.BlockSpec((block_rows, dim), lambda i: (i, 0))]
    args = [x2]
    if affine:
        # Pre-cast params to f32 once in the wrapper; resident across the grid.
        scale2 = scale.reshape(1, dim).astype(jnp.float32)
        bias2 = bias.reshape(1, dim).astype(jnp.float32)
        in_specs += [
            pl.BlockSpec((1, dim), lambda i: (0, 0)),
            pl.BlockSpec((1, dim), lambda i: (0, 0)),
        ]
        args += [scale2, bias2]

    kernel = functools.partial(
        _rmsnorm_kernel,
        dim=dim,
        d_x=d_x,
        eps=eps,
        affine=affine,
        mask_cols=(d_x < dim),
    )

    # TODO(synk): if profiling on v6e/v5e shows exposed DMA gaps, add
    # pipeline_mode=pl.Buffered(3) on the x BlockSpec and/or raise
    # vmem_limit_bytes to ~48-64 MiB there (128 MiB physical VMEM headroom).
    out = pl.pallas_call(
        kernel,
        out_shape=jax.ShapeDtypeStruct((rows, dim), x.dtype),
        grid_spec=pltpu.PrefetchScalarGridSpec(
            num_scalar_prefetch=0,
            grid=grid,
            in_specs=in_specs,
            out_specs=pl.BlockSpec((block_rows, dim), lambda i: (i, 0)),
        ),
        compiler_params=pltpu.CompilerParams(
            dimension_semantics=("parallel",),
            vmem_limit_bytes=32 << 20,
        ),
    )(*args)

    return out.reshape(orig_shape)


if __name__ == "__main__":
    key = jax.random.PRNGKey(0)
    k1, k2 = jax.random.split(key)

    seq, hidden = 8, 32
    x = jax.random.normal(k1, (seq, hidden), dtype=jnp.float32)

    # Parameters matching nn.Parameter(torch.ones / torch.zeros).
    scale = jnp.ones((hidden,), dtype=jnp.float32)
    bias = jnp.zeros((hidden,), dtype=jnp.float32)

    # --- default path: p=-1.0 (full-feature norm), affine=True --------------
    out = rmsnorm(x, scale, bias, p=-1.0, eps=1e-8, affine=True)
    out = jax.block_until_ready(out)

    norm_x = jnp.linalg.norm(x, ord=2, axis=-1, keepdims=True)
    rms_x = norm_x * (hidden ** -0.5)
    ref = (x / (rms_x + 1e-8)) * scale + bias
    assert jnp.allclose(out, ref, atol=1e-5, rtol=1e-5), "full-norm mismatch"

    # --- partial norm path: p=0.5 --------------------------------------------
    out_p = rmsnorm(x, scale, bias, p=0.5, eps=1e-8, affine=True)
    out_p = jax.block_until_ready(out_p)
    d_x = int(hidden * 0.5)
    norm_p = jnp.linalg.norm(x[:, :d_x], ord=2, axis=-1, keepdims=True)
    rms_p = norm_p * (d_x ** -0.5)
    ref_p = (x / (rms_p + 1e-8)) * scale + bias
    assert jnp.allclose(out_p, ref_p, atol=1e-5, rtol=1e-5), "partial-norm mismatch"

    # --- affine=False path ----------------------------------------------------
    out_na = rmsnorm(x, p=-1.0, eps=1e-8, affine=False)
    out_na = jax.block_until_ready(out_na)
    ref_na = x / (rms_x + 1e-8)
    assert jnp.allclose(out_na, ref_na, atol=1e-5, rtol=1e-5), "no-affine mismatch"

    # --- multi-dim leading axes + ragged last row block (rows % block != 0) ---
    x3 = jax.random.normal(k2, (2, 5, hidden), dtype=jnp.float32)
    out3 = rmsnorm(x3, scale, bias, p=-1.0, eps=1e-8, affine=True)
    out3 = jax.block_until_ready(out3)
    norm3 = jnp.linalg.norm(x3, ord=2, axis=-1, keepdims=True)
    rms3 = norm3 * (hidden ** -0.5)
    ref3 = (x3 / (rms3 + 1e-8)) * scale + bias
    assert jnp.allclose(out3, ref3, atol=1e-5, rtol=1e-5), "multi-dim mismatch"

    print("KERNEL_OK")
</pallas_src>

<mosaic_0001>
module attributes {stable_mosaic.version = 11 : i64} {
  func.func @_rmsnorm_kernel(%arg0: i32, %arg1: memref<8x32xf32, #tpu.memory_space<vmem>>, %arg2: memref<1x32xf32, #tpu.memory_space<vmem>>, %arg3: memref<1x32xf32, #tpu.memory_space<vmem>>, %arg4: memref<8x32xf32, #tpu.memory_space<vmem>>) attributes {dimension_semantics = [#tpu.dimension_semantics<parallel>], iteration_bounds = array<i64: 1>, scalar_prefetch = 0 : i64, scratch_operands = 0 : i64, tpu.core_type = #tpu.core_type<tc>, window_params = [{transform_indices = @transform_0, window_bounds = array<i64: 8, 32>}, {pipeline_mode = #tpu.pipeline_mode<synchronous>, transform_indices = @transform_1, window_bounds = array<i64: 1, 32>}, {pipeline_mode = #tpu.pipeline_mode<synchronous>, transform_indices = @transform_2, window_bounds = array<i64: 1, 32>}, {transform_indices = @transform_3, window_bounds = array<i64: 8, 32>}]} {
    %c0 = arith.constant 0 : index
    %c0_0 = arith.constant 0 : index
    %0 = vector.load %arg1[%c0, %c0_0] : memref<8x32xf32, #tpu.memory_space<vmem>>, vector<8x32xf32>
    %1 = arith.mulf %0, %0 : vector<8x32xf32>
    %cst = arith.constant dense<0.000000e+00> : vector<8xf32>
    %2 = vector.multi_reduction <add>, %1, %cst [1] : vector<8x32xf32> to vector<8xf32>
    %3 = vector.shape_cast %2 : vector<8xf32> to vector<8x1xf32>
    %4 = math.sqrt %3 : vector<8x1xf32>
    %cst_1 = arith.constant 0.176776692 : f32
    %5 = vector.broadcast %cst_1 : f32 to vector<8x1xf32>
    %6 = arith.mulf %4, %5 : vector<8x1xf32>
    %cst_2 = arith.constant 9.99999993E-9 : f32
    %7 = vector.broadcast %cst_2 : f32 to vector<8x1xf32>
    %8 = arith.addf %6, %7 : vector<8x1xf32>
    %cst_3 = arith.constant 1.000000e+00 : f32
    %9 = vector.broadcast %cst_3 : f32 to vector<8x1xf32>
    %10 = arith.divf %9, %8 : vector<8x1xf32>
    %11 = vector.broadcast %10 : vector<8x1xf32> to vector<8x32xf32>
    %12 = arith.mulf %0, %11 : vector<8x32xf32>
    %c0_4 = arith.constant 0 : index
    %c0_5 = arith.constant 0 : index
    %13 = vector.load %arg2[%c0_4, %c0_5] : memref<1x32xf32, #tpu.memory_space<vmem>>, vector<1x32xf32>
    %14 = vector.broadcast %13 : vector<1x32xf32> to vector<8x32xf32>
    %15 = arith.mulf %12, %14 : vector<8x32xf32>
    %c0_6 = arith.constant 0 : index
    %c0_7 = arith.constant 0 : index
    %16 = vector.load %arg3[%c0_6, %c0_7] : memref<1x32xf32, #tpu.memory_space<vmem>>, vector<1x32xf32>
    %17 = vector.broadcast %16 : vector<1x32xf32> to vector<8x32xf32>
    %18 = arith.addf %15, %17 : vector<8x32xf32>
    %c0_8 = arith.constant 0 : index
    %c0_9 = arith.constant 0 : index
    %19 = vector.load %arg4[%c0_8, %c0_9] : memref<8x32xf32, #tpu.memory_space<vmem>>, vector<8x32xf32>
    tpu.vector_store %arg4[%c0_8, %c0_9], %18 {strides = array<i32>} : memref<8x32xf32, #tpu.memory_space<vmem>>, vector<8x32xf32>,
    return
  }
  func.func @transform_0(%arg0: i32) -> (i32, i32) {
    %c0_i32 = arith.constant 0 : i32
    %c0_i32_0 = arith.constant 0 : i32
    return %arg0, %c0_i32 : i32, i32
  }
  func.func @transform_1(%arg0: i32) -> (i32, i32) {
    %c0_i32 = arith.constant 0 : i32
    %c0_i32_0 = arith.constant 0 : i32
    %c0_i32_1 = arith.constant 0 : i32
    return %c0_i32, %c0_i32_0 : i32, i32
  }
  func.func @transform_2(%arg0: i32) -> (i32, i32) {
    %c0_i32 = arith.constant 0 : i32
    %c0_i32_0 = arith.constant 0 : i32
    %c0_i32_1 = arith.constant 0 : i32
    return %c0_i32, %c0_i32_0 : i32, i32
  }
  func.func @transform_3(%arg0: i32) -> (i32, i32) {
    %c0_i32 = arith.constant 0 : i32
    %c0_i32_0 = arith.constant 0 : i32
    return %arg0, %c0_i32 : i32, i32
  }
}

</mosaic_0001>

<bundles_post_ra>
// kernel: tpu_custom_call.1
= control target key start
LH: loop header
LB: loop body
LE: loop exit
PB: predicated region body
PF: predicated region fallthrough
CT: control target
= control target key end

     0   :  { %8 = vsyncpa [#allocation3], 0  ;;  %s165_s0 = inlined_call_operand.hbm [shape: f32[8,32], index: 0, kind: input, shape index: {}]   ;;  %s166_s1 = inlined_call_operand.vmem [shape: f32[1,32], index: 1, kind: input, shape index: {}]   ;;  %s167_s2 = inlined_call_operand.vmem [shape: f32[1,32], index: 2, kind: input, shape index: {}]   ;;  %s168_s3 = inlined_call_operand.hbm [shape: f32[8,32], index: 3, kind: output, shape index: {}]  }
   0x1   :  { %9 = vsyncpa [#allocation4], 0  ;;  %s129_s12 = smov [#allocation2]  }
   0x2   :  { %s16_s13 = sshll.u32 %s129_s12, 4  ;;  %s17_s13 = int_to_ptr.vmem [resolvable:$true] %s16_s13 }
   0x3   :  { %s93_s14 = scalar_lea.vmem %s17_s13, 128  ;;  %p98_p1 = scmp.lt.s32.totalorder %s17_s13, %s17_s13 }
   0x4   :  { %p94_p0 = scmp.ne.s32.totalorder %s17_s13, %s93_s14  ;;  %p99_p2 = scmp.lt.s32.totalorder %s93_s14, %s93_s14 }
   0x6   :  { %p100_p3 = por %p99_p2, %p98_p1 }
   0x8   :  { %p101_p4 = pnand %p100_p3, %p94_p0 }
   0xa   :  { %104 = shalt.err (!%p101_p4)
}
   0xb   :  { %19 = dma.hbm_to_vmem [thread:$0]  %s165_s0, 128, %s17_s13, [#allocation3]  }
   0xc   :  { %125 = dma.done.wait [#allocation3], 128  }
   0xd   :  { %126 = vsyncadd [#allocation3], 4294967168  ;;  %v27_v0 = vld [vmem:[#allocation2] sm:$0xff]  ;;  %vm29_vm0 = vcmask 261120   ;;  %s130_s20 = smov [#allocation5]  }
   0xe   :  { %v28_v1 = vmul.f32 %v27_v0, %v27_v0  ;;  %v77_v12 = vld [vmem:[%s166_s1] ss:$0 sm:$0xff]  ;;  %s68_s21 = sshll.u32 %s130_s20, 4  ;;  %s69_s21 = int_to_ptr.vmem [resolvable:$true] %s68_s21 }
   0xf   :  { %v78_v14 = vld [vmem:[%s167_s2] ss:$0 sm:$0xff]  ;;  %s105_s22 = scalar_lea.vmem %s69_s21, 128  ;;  %p110_p6 = scmp.lt.s32.totalorder %s69_s21, %s69_s21 }
  0x10   :  { %v30_v2 = vsel %vm29_vm0, %v28_v1, 0.0  ;;  %p106_p5 = scmp.ne.s32.totalorder %s69_s21, %s105_s22  ;;  %p111_p7 = scmp.lt.s32.totalorder %s105_s22, %s105_s22 }
  0x11   :  { %31 = vadd.xlane.f32.xlu0 %v30_v2 }
  0x12   :  { %p112_p8 = por %p111_p7, %p110_p6 }
  0x14   :  { %p113_p9 = pnand %p112_p8, %p106_p5 }
  0x9a   :  { %v32_v3 = vpop.xlane.xlu0 %31 }
  0x9b   :  { %81 = vrsqrt.f32 %v32_v3  ;;  %vm35_vm1 = vcmp.eq.f32.partialorder %v32_v3, inf  ;;  %v38_v6 = vand.u32 2147483648, %v32_v3  ;;  %vm37_vm2 = vcmp.eq.f32.partialorder %v32_v3, 0.0 }
  0xa8   :  { %v82_v4 = vpop.eup %81 }
  0xa9   :  { %v34_v5 = vmul.f32 %v82_v4, %v32_v3 }
  0xab   :  { %v36_v7 = vsel %vm35_vm1, %v32_v3, %v34_v5 }
  0xac   :  { %v39_v8 = vsel %vm37_vm2, %v38_v6, %v36_v7 }
  0xad   :  { %v40_v9 = vmul.f32 0.17677669, %v39_v8 }
  0xaf   :  { %v41_v10 = vadd.f32 1e-08, %v40_v9 }
  0xb1   :  { %83 = vrcp.f32 %v41_v10 }
  0xbe   :  { %v84_v11 = vpop.eup %83 }
  0xbf   :  { %v44_v13 = vmul.f32 %v84_v11, %v27_v0 }
  0xc1   :  { %v52_v15 = vmul.f32 %v77_v12, %v44_v13 }
  0xc3   :  { %v60_v16 = vadd.f32 %v78_v14, %v52_v15 }
  0xc5   :  { %61 = vst.msk [vmem:[#allocation5] sm:$0xff] %vm29_vm0, %v60_v16 }
  0xc6   :  { %116 = shalt.err (!%p113_p9)
}
  0xc7   :  { %71 = dma.vmem_to_hbm [thread:$0]  %s69_s21, 128, %s168_s3, [#allocation4]  }
  0xc8   :  { %127 = dma.done.wait [#allocation4], 128  }
  0xc9   :  { %128 = vsyncadd [#allocation4], 4294967168 }
  0xca   :  { %75 = vsyncpa [#allocation3], 1 }
  0xcb   :  { %76 = vsyncpa [#allocation4], 1 }

</bundles_post_ra>
